<compile_context>
chip_gen: v7x
topology: tpu7x:2x2x1
jax: 0.10.0
libtpu: 0.0.40
codegen_flags: <defaults>
</compile_context>

<pallas_src>
from functools import partial

import jax
import jax.numpy as jnp
from jax import lax
from jax.experimental import pallas as pl
from jax.experimental.pallas import tpu as pltpu

_BN_EPS = 1e-5
_LANE = 128   # last-dim (lane) tile
_SUB = 16     # sublane padding for the batch dim (bf16 packs [16,128] per vreg)


def _round_up(n, m):
    return ((n + m - 1) // m) * m


def _pad2d(a, rows, cols):
    return jnp.pad(a, ((0, rows - a.shape[0]), (0, cols - a.shape[1])))


# -----------------------------------------------------------------------------
# Kernel
# -----------------------------------------------------------------------------
def _make_fused_mlp_kernel(num_hidden, n_valid, b_pad, widths_pad):
    """refs = (x, w_0 .. w_L, vec_pack, out).

    widths_pad[i] = lane-padded output width of layer i (len = num_hidden + 1).
    vec_pack rows: [b_0, gamma_0, beta_0, b_1, gamma_1, beta_1, ..., b_out].
    """
    masked = (n_valid != b_pad)          # trace-time: skip mask math when aligned
    inv_n = 1.0 / float(n_valid)

    def kernel(*refs):
        x_ref = refs[0]
        w_refs = refs[1:1 + num_hidden + 1]
        vec_ref = refs[-2]
        o_ref = refs[-1]

        h = x_ref[...]                   # (b_pad, in_pad) f32, resident in VMEM

        if masked:
            # Zero-padded batch rows must not contaminate the BN batch stats.
            row_ids = lax.broadcasted_iota(jnp.int32, (b_pad, 1), 0)
            valid = (row_ids < n_valid).astype(jnp.float32)

        for i in range(num_hidden):
            n = widths_pad[i]
            bias = vec_ref[3 * i:3 * i + 1, :n]          # (1, n) static slices
            gamma = vec_ref[3 * i + 1:3 * i + 2, :n]
            beta = vec_ref[3 * i + 2:3 * i + 3, :n]

            # Linear: bf16 operands, f32 accumulation on the MXU.
            h = jnp.dot(h.astype(jnp.bfloat16), w_refs[i][...],
                        preferred_element_type=jnp.float32) + bias

            # ELU (alpha=1): clamp before exp so the unselected branch is finite.
            # (exp rides the EUP slot; expm1 avoided for lowering portability.)
            h = jnp.where(h > 0, h, jnp.exp(jnp.minimum(h, 0.0)) - 1.0)

            # BatchNorm1d (training-mode batch stats), two-pass variance
            # (matches the reference exactly), folded affine apply.
            if masked:
                mean = jnp.sum(h * valid, axis=0, keepdims=True) * inv_n
                d = h - mean
                dv = d * valid
                var = jnp.sum(dv * dv, axis=0, keepdims=True) * inv_n
            else:
                mean = jnp.sum(h, axis=0, keepdims=True) * inv_n
                d = h - mean
                var = jnp.sum(d * d, axis=0, keepdims=True) * inv_n
            scale = gamma * lax.rsqrt(var + _BN_EPS)     # (1, n) row — cheap
            h = d * scale + beta                          # 2 (B,N) passes total

        # Final Linear (no activation / BN).
        out_n = widths_pad[num_hidden]
        b_out = vec_ref[3 * num_hidden:3 * num_hidden + 1, :out_n]
        o_ref[...] = jnp.dot(h.astype(jnp.bfloat16), w_refs[num_hidden][...],
                             preferred_element_type=jnp.float32) + b_out

    return kernel


# -----------------------------------------------------------------------------
# Parameter preparation (runs ONCE, outside the hot path)
# -----------------------------------------------------------------------------
def prepare_mlp_params(params):
    """Pad to lane multiples, cast weights to bf16, pack all row vectors."""
    num_hidden = len(params) - 1
    weights = []
    widths_pad = []
    for p in params:
        k_pad = _round_up(p["w"].shape[0], _LANE)
        n_pad = _round_up(p["w"].shape[1], _LANE)
        weights.append(_pad2d(p["w"], k_pad, n_pad).astype(jnp.bfloat16))
        widths_pad.append(n_pad)
    max_n = max(widths_pad)

    vec = jnp.zeros((3 * num_hidden + 1, max_n), jnp.float32)
    for i, p in enumerate(params):
        n = p["w"].shape[1]
        if i != num_hidden:
            vec = vec.at[3 * i, :n].set(p["b"][0])
            vec = vec.at[3 * i + 1, :n].set(p["gamma"][0])
            vec = vec.at[3 * i + 2, :n].set(p["beta"][0])
        else:
            vec = vec.at[3 * num_hidden, :n].set(p["b"][0])

    return {
        "weights": tuple(jax.device_put(w) for w in weights),
        "vec": jax.device_put(vec),
        "n_classes": int(params[-1]["w"].shape[1]),
    }


# -----------------------------------------------------------------------------
# Forward
# -----------------------------------------------------------------------------
@partial(jax.jit, static_argnames=("n_classes",))
def _mlp_forward_prepared(weights, vec, x, *, n_classes):
    batch, _ = x.shape
    num_hidden = len(weights) - 1
    widths_pad = tuple(int(w.shape[1]) for w in weights)
    in_pad = int(weights[0].shape[0])
    out_pad = widths_pad[-1]
    b_pad = _round_up(batch, _SUB)

    x_pad = _pad2d(x.astype(jnp.float32), b_pad, in_pad)

    # Explicit scoped-VMEM budget with headroom (v5e default is only 16 MiB);
    # capped at 64 MiB so it is also safe on v7x.
    io_bytes = (x_pad.size * 4 + sum(int(w.size) * 2 for w in weights)
                + int(vec.size) * 4 + b_pad * out_pad * 4)
    act_bytes = b_pad * max((in_pad,) + widths_pad) * 4
    vmem_bytes = int(min(64 << 20, 2 * io_bytes + 8 * act_bytes + (4 << 20)))

    # Whole model (weights + activations) stays resident in VMEM: one kernel,
    # no grid, no HBM round-trips for intermediates.
    # TODO(synk): for large batches add a "parallel" batch grid axis (2 TCs on
    # v7x) with >=512-row tiles and a two-pass cross-tile BN reduction, and
    # re-derive the residency budget against v7x's 64 MiB VMEM.
    # TODO(synk): for large weight matrices keep weights in pl.ANY and
    # double-buffer per-layer pltpu.make_async_copy so layer l compute overlaps
    # layer l+1 weight DMA instead of a serialized prologue transfer.
    vmem = pl.BlockSpec(memory_space=pltpu.MemorySpace.VMEM)
    out = pl.pallas_call(
        _make_fused_mlp_kernel(num_hidden, batch, b_pad, widths_pad),
        out_shape=jax.ShapeDtypeStruct((b_pad, out_pad), jnp.float32),
        in_specs=[vmem] * (1 + len(weights) + 1),
        out_specs=vmem,
        compiler_params=pltpu.CompilerParams(vmem_limit_bytes=vmem_bytes),
    )(x_pad, *weights, vec)
    return out[:batch, :n_classes]


def mlp_forward(prepared, x):
    return _mlp_forward_prepared(prepared["weights"], prepared["vec"], x,
                                 n_classes=prepared["n_classes"])


# -----------------------------------------------------------------------------
# Init + pure-JAX reference
# -----------------------------------------------------------------------------
def init_mlp_params(key, n_inputs, n_hidden, n_classes):
    """Deterministic init mirroring nn.Linear's U(-1/sqrt(fan_in), 1/sqrt(fan_in))."""
    dims = [n_inputs] + list(n_hidden) + [n_classes]
    params = []
    for i in range(len(dims) - 1):
        fan_in, fan_out = dims[i], dims[i + 1]
        key, kw, kb = jax.random.split(key, 3)
        bound = 1.0 / (fan_in ** 0.5)
        w = jax.random.uniform(kw, (fan_in, fan_out), jnp.float32,
                               minval=-bound, maxval=bound)
        b = jax.random.uniform(kb, (1, fan_out), jnp.float32,
                               minval=-bound, maxval=bound)
        if i == len(dims) - 2:
            params.append({"w": w, "b": b})
        else:
            params.append({"w": w, "b": b,
                           "gamma": jnp.ones((1, fan_out), jnp.float32),
                           "beta": jnp.zeros((1, fan_out), jnp.float32)})
    return params


def mlp_forward_ref(params, x):
    """Pure-JAX reference (same bf16-operand / f32-accumulate matmul contract)."""
    out = x
    num_hidden = len(params) - 1
    for i, p in enumerate(params):
        out = jnp.dot(out.astype(jnp.bfloat16), p["w"].astype(jnp.bfloat16),
                      preferred_element_type=jnp.float32) + p["b"]
        if i != num_hidden:
            out = jnp.where(out > 0, out, jnp.exp(jnp.minimum(out, 0.0)) - 1.0)
            mean = jnp.mean(out, axis=0, keepdims=True)
            var = jnp.mean((out - mean) ** 2, axis=0, keepdims=True)
            out = (out - mean) / jnp.sqrt(var + _BN_EPS)
            out = out * p["gamma"] + p["beta"]
    return out


if __name__ == "__main__":
    key = jax.random.PRNGKey(0)
    key_x, key_x2, key_p = jax.random.split(key, 3)

    n_inputs = 32
    n_hidden = [64, 32]
    n_classes = 16
    params = init_mlp_params(key_p, n_inputs, n_hidden, n_classes)
    prepared = prepare_mlp_params(params)

    # Case 1: bf16-sublane-aligned batch (16 rows) -> unmasked BN-stats path.
    batch = 16
    x = jax.random.normal(key_x, (batch, n_inputs), jnp.float32)
    out = jax.block_until_ready(mlp_forward(prepared, x))
    ref = mlp_forward_ref(params, x)
    assert out.shape == (batch, n_classes), out.shape
    assert jnp.allclose(out, ref, atol=1e-3, rtol=1e-3), (
        float(jnp.max(jnp.abs(out - ref))))

    # Case 2: non-aligned batch -> exercises padded-row masking of BN stats.
    batch2 = 6
    x2 = jax.random.normal(key_x2, (batch2, n_inputs), jnp.float32)
    out2 = jax.block_until_ready(mlp_forward(prepared, x2))
    ref2 = mlp_forward_ref(params, x2)
    assert out2.shape == (batch2, n_classes), out2.shape
    assert jnp.allclose(out2, ref2, atol=1e-3, rtol=1e-3), (
        float(jnp.max(jnp.abs(out2 - ref2))))

    print("KERNEL_OK")
</pallas_src>

<mosaic_0001>
module attributes {stable_mosaic.version = 11 : i64} {
  func.func @kernel(%arg0: memref<16x128xf32, #tpu.memory_space<vmem>>, %arg1: memref<128x128xbf16, #tpu.memory_space<vmem>>, %arg2: memref<128x128xbf16, #tpu.memory_space<vmem>>, %arg3: memref<128x128xbf16, #tpu.memory_space<vmem>>, %arg4: memref<7x128xf32, #tpu.memory_space<vmem>>, %arg5: memref<16x128xf32, #tpu.memory_space<vmem>>) attributes {dimension_semantics = [], scalar_prefetch = 0 : i64, scratch_operands = 0 : i64, tpu.core_type = #tpu.core_type<tc>} {
    %c0 = arith.constant 0 : index
    %c0_0 = arith.constant 0 : index
    %0 = vector.load %arg0[%c0, %c0_0] : memref<16x128xf32, #tpu.memory_space<vmem>>, vector<16x128xf32>
    %c0_1 = arith.constant 0 : index
    %c0_2 = arith.constant 0 : index
    %1 = vector.load %arg4[%c0_1, %c0_2] : memref<7x128xf32, #tpu.memory_space<vmem>>, vector<1x128xf32>
    %c1 = arith.constant 1 : index
    %c0_3 = arith.constant 0 : index
    %2 = vector.load %arg4[%c1, %c0_3] : memref<7x128xf32, #tpu.memory_space<vmem>>, vector<1x128xf32>
    %c2 = arith.constant 2 : index
    %c0_4 = arith.constant 0 : index
    %3 = vector.load %arg4[%c2, %c0_4] : memref<7x128xf32, #tpu.memory_space<vmem>>, vector<1x128xf32>
    %4 = arith.truncf %0 : vector<16x128xf32> to vector<16x128xbf16>
    %c0_5 = arith.constant 0 : index
    %c0_6 = arith.constant 0 : index
    %5 = vector.load %arg1[%c0_5, %c0_6] : memref<128x128xbf16, #tpu.memory_space<vmem>>, vector<128x128xbf16>
    %cst = arith.constant dense<0.000000e+00> : vector<16x128xf32>
    %6 = tpu.matmul %4, %5, %cst {dimension_numbers = #tpu.dot_dimension_numbers<[1], [0], [0], [1], [0, 0, 1, 1], [], []>} : vector<16x128xbf16>, vector<128x128xbf16>, vector<16x128xf32> -> vector<16x128xf32>
    %7 = vector.broadcast %1 : vector<1x128xf32> to vector<16x128xf32>
    %8 = arith.addf %6, %7 : vector<16x128xf32>
    %cst_7 = arith.constant 0.000000e+00 : f32
    %9 = vector.broadcast %cst_7 : f32 to vector<16x128xf32>
    %10 = arith.cmpf ogt, %8, %9 : vector<16x128xf32>
    %cst_8 = arith.constant 0.000000e+00 : f32
    %11 = vector.broadcast %cst_8 : f32 to vector<16x128xf32>
    %12 = arith.minimumf %8, %11 : vector<16x128xf32>
    %13 = math.exp %12 : vector<16x128xf32>
    %cst_9 = arith.constant 1.000000e+00 : f32
    %14 = vector.broadcast %cst_9 : f32 to vector<16x128xf32>
    %15 = arith.subf %13, %14 : vector<16x128xf32>
    %16 = arith.select %10, %8, %15 : vector<16x128xi1>, vector<16x128xf32>
    %cst_10 = arith.constant dense<0.000000e+00> : vector<128xf32>
    %17 = vector.multi_reduction <add>, %16, %cst_10 [0] : vector<16x128xf32> to vector<128xf32>
    %18 = vector.shape_cast %17 : vector<128xf32> to vector<1x128xf32>
    %cst_11 = arith.constant 6.250000e-02 : f32
    %19 = vector.broadcast %cst_11 : f32 to vector<1x128xf32>
    %20 = arith.mulf %18, %19 : vector<1x128xf32>
    %21 = vector.broadcast %20 : vector<1x128xf32> to vector<16x128xf32>
    %22 = arith.subf %16, %21 : vector<16x128xf32>
    %23 = arith.mulf %22, %22 : vector<16x128xf32>
    %cst_12 = arith.constant dense<0.000000e+00> : vector<128xf32>
    %24 = vector.multi_reduction <add>, %23, %cst_12 [0] : vector<16x128xf32> to vector<128xf32>
    %25 = vector.shape_cast %24 : vector<128xf32> to vector<1x128xf32>
    %cst_13 = arith.constant 6.250000e-02 : f32
    %26 = vector.broadcast %cst_13 : f32 to vector<1x128xf32>
    %27 = arith.mulf %25, %26 : vector<1x128xf32>
    %cst_14 = arith.constant 9.99999974E-6 : f32
    %28 = vector.broadcast %cst_14 : f32 to vector<1x128xf32>
    %29 = arith.addf %27, %28 : vector<1x128xf32>
    %30 = math.rsqrt %29 : vector<1x128xf32>
    %31 = arith.mulf %2, %30 : vector<1x128xf32>
    %32 = vector.broadcast %31 : vector<1x128xf32> to vector<16x128xf32>
    %33 = arith.mulf %22, %32 : vector<16x128xf32>
    %34 = vector.broadcast %3 : vector<1x128xf32> to vector<16x128xf32>
    %35 = arith.addf %33, %34 : vector<16x128xf32>
    %c3 = arith.constant 3 : index
    %c0_15 = arith.constant 0 : index
    %36 = vector.load %arg4[%c3, %c0_15] : memref<7x128xf32, #tpu.memory_space<vmem>>, vector<1x128xf32>
    %c4 = arith.constant 4 : index
    %c0_16 = arith.constant 0 : index
    %37 = vector.load %arg4[%c4, %c0_16] : memref<7x128xf32, #tpu.memory_space<vmem>>, vector<1x128xf32>
    %c5 = arith.constant 5 : index
    %c0_17 = arith.constant 0 : index
    %38 = vector.load %arg4[%c5, %c0_17] : memref<7x128xf32, #tpu.memory_space<vmem>>, vector<1x128xf32>
    %39 = arith.truncf %35 : vector<16x128xf32> to vector<16x128xbf16>
    %c0_18 = arith.constant 0 : index
    %c0_19 = arith.constant 0 : index
    %40 = vector.load %arg2[%c0_18, %c0_19] : memref<128x128xbf16, #tpu.memory_space<vmem>>, vector<128x128xbf16>
    %cst_20 = arith.constant dense<0.000000e+00> : vector<16x128xf32>
    %41 = tpu.matmul %39, %40, %cst_20 {dimension_numbers = #tpu.dot_dimension_numbers<[1], [0], [0], [1], [0, 0, 1, 1], [], []>} : vector<16x128xbf16>, vector<128x128xbf16>, vector<16x128xf32> -> vector<16x128xf32>
    %42 = vector.broadcast %36 : vector<1x128xf32> to vector<16x128xf32>
    %43 = arith.addf %41, %42 : vector<16x128xf32>
    %cst_21 = arith.constant 0.000000e+00 : f32
    %44 = vector.broadcast %cst_21 : f32 to vector<16x128xf32>
    %45 = arith.cmpf ogt, %43, %44 : vector<16x128xf32>
    %cst_22 = arith.constant 0.000000e+00 : f32
    %46 = vector.broadcast %cst_22 : f32 to vector<16x128xf32>
    %47 = arith.minimumf %43, %46 : vector<16x128xf32>
    %48 = math.exp %47 : vector<16x128xf32>
    %cst_23 = arith.constant 1.000000e+00 : f32
    %49 = vector.broadcast %cst_23 : f32 to vector<16x128xf32>
    %50 = arith.subf %48, %49 : vector<16x128xf32>
    %51 = arith.select %45, %43, %50 : vector<16x128xi1>, vector<16x128xf32>
    %cst_24 = arith.constant dense<0.000000e+00> : vector<128xf32>
    %52 = vector.multi_reduction <add>, %51, %cst_24 [0] : vector<16x128xf32> to vector<128xf32>
    %53 = vector.shape_cast %52 : vector<128xf32> to vector<1x128xf32>
    %cst_25 = arith.constant 6.250000e-02 : f32
    %54 = vector.broadcast %cst_25 : f32 to vector<1x128xf32>
    %55 = arith.mulf %53, %54 : vector<1x128xf32>
    %56 = vector.broadcast %55 : vector<1x128xf32> to vector<16x128xf32>
    %57 = arith.subf %51, %56 : vector<16x128xf32>
    %58 = arith.mulf %57, %57 : vector<16x128xf32>
    %cst_26 = arith.constant dense<0.000000e+00> : vector<128xf32>
    %59 = vector.multi_reduction <add>, %58, %cst_26 [0] : vector<16x128xf32> to vector<128xf32>
    %60 = vector.shape_cast %59 : vector<128xf32> to vector<1x128xf32>
    %cst_27 = arith.constant 6.250000e-02 : f32
    %61 = vector.broadcast %cst_27 : f32 to vector<1x128xf32>
    %62 = arith.mulf %60, %61 : vector<1x128xf32>
    %cst_28 = arith.constant 9.99999974E-6 : f32
    %63 = vector.broadcast %cst_28 : f32 to vector<1x128xf32>
    %64 = arith.addf %62, %63 : vector<1x128xf32>
    %65 = math.rsqrt %64 : vector<1x128xf32>
    %66 = arith.mulf %37, %65 : vector<1x128xf32>
    %67 = vector.broadcast %66 : vector<1x128xf32> to vector<16x128xf32>
    %68 = arith.mulf %57, %67 : vector<16x128xf32>
    %69 = vector.broadcast %38 : vector<1x128xf32> to vector<16x128xf32>
    %70 = arith.addf %68, %69 : vector<16x128xf32>
    %c6 = arith.constant 6 : index
    %c0_29 = arith.constant 0 : index
    %71 = vector.load %arg4[%c6, %c0_29] : memref<7x128xf32, #tpu.memory_space<vmem>>, vector<1x128xf32>
    %72 = arith.truncf %70 : vector<16x128xf32> to vector<16x128xbf16>
    %c0_30 = arith.constant 0 : index
    %c0_31 = arith.constant 0 : index
    %73 = vector.load %arg3[%c0_30, %c0_31] : memref<128x128xbf16, #tpu.memory_space<vmem>>, vector<128x128xbf16>
    %cst_32 = arith.constant dense<0.000000e+00> : vector<16x128xf32>
    %74 = tpu.matmul %72, %73, %cst_32 {dimension_numbers = #tpu.dot_dimension_numbers<[1], [0], [0], [1], [0, 0, 1, 1], [], []>} : vector<16x128xbf16>, vector<128x128xbf16>, vector<16x128xf32> -> vector<16x128xf32>
    %75 = vector.broadcast %71 : vector<1x128xf32> to vector<16x128xf32>
    %76 = arith.addf %74, %75 : vector<16x128xf32>
    %c0_33 = arith.constant 0 : index
    %c0_34 = arith.constant 0 : index
    %77 = vector.load %arg5[%c0_33, %c0_34] : memref<16x128xf32, #tpu.memory_space<vmem>>, vector<16x128xf32>
    tpu.vector_store %arg5[%c0_33, %c0_34], %76 {strides = array<i32>} : memref<16x128xf32, #tpu.memory_space<vmem>>, vector<16x128xf32>,
    return
  }
}

</mosaic_0001>

<bundles_post_ra>
// kernel: _mlp_forward_prepared.1
= control target key start
LH: loop header
LB: loop body
LE: loop exit
PB: predicated region body
PF: predicated region fallthrough
CT: control target
= control target key end

     0   :  { %10 = vsyncpa [#allocation3], 0  ;;  %s944_s0 = inlined_call_operand.vmem [shape: f32[16,128], index: 0, kind: input, shape index: {}]   ;;  %s945_s1 = inlined_call_operand.hbm [shape: bf16[128,128], index: 1, kind: input, shape index: {}]   ;;  %s946_s2 = inlined_call_operand.hbm [shape: bf16[128,128], index: 2, kind: input, shape index: {}]   ;;  %s947_s3 = inlined_call_operand.hbm [shape: bf16[128,128], index: 3, kind: input, shape index: {}]   ;;  %s948_s4 = inlined_call_operand.vmem [shape: f32[7,128], index: 4, kind: input, shape index: {}]   ;;  %s949_s5 = inlined_call_operand.hbm [shape: f32[16,128], index: 5, kind: output, shape index: {}]  }
   0x1   :  { %11 = vsyncpa [#allocation6], 0 }
   0x2   :  { %12 = vsyncpa [#allocation4], 0  ;;  %s776_s18 = smov [#allocation5]   ;;  %s777_s20 = smov [#allocation2]  }
   0x3   :  { %s32_s19 = sshll.u32 %s776_s18, 4  ;;  %s20_s21 = sshll.u32 %s777_s20, 4  ;;  %s33_s19 = int_to_ptr.vmem [resolvable:$true] %s32_s19  ;;  %s816_s21 = int_to_ptr.vmem [resolvable:$true] %s20_s21 }
   0x4   :  { %s682_s24 = scalar_lea.hbm %s946_s2, 1024 }
   0x5   :  { %p683_p0 = scmp.ne.s32.totalorder %s946_s2, %s682_s24  ;;  %p686_p1 = scmp.lt.u32.totalorder %s682_s24, %s946_s2 }
   0x7   :  { %p688_p2 = pnand %p686_p1, %p683_p0 }
   0x9   :  { %691 = shalt.err (!%p688_p2)
}
   0xa   :  { %s692_s29 = scalar_lea.vmem %s33_s19, 1024  ;;  %p697_p4 = scmp.lt.s32.totalorder %s33_s19, %s33_s19 }
   0xb   :  { %p693_p3 = scmp.ne.s32.totalorder %s33_s19, %s692_s29  ;;  %p698_p5 = scmp.lt.s32.totalorder %s692_s29, %s692_s29 }
   0xd   :  { %p699_p6 = por %p698_p5, %p697_p4 }
   0xf   :  { %p700_p7 = pnand %p699_p6, %p693_p3 }
  0x11   :  { %703 = shalt.err (!%p700_p7)
}
  0x12   :  { %s778_s30 = smov 64   ;;  %s779_s6 = smov 4  }
  0x13   :  { %38 = dma.hbm_to_vmem [thread:$0]  %s946_s2, 1024, %s33_s19, [#allocation6], %s778_s30, %s778_s30, %s779_s6  }
  0x14   :  { %s704_s11 = scalar_lea.hbm %s945_s1, 1024 }
  0x15   :  { %p705_p8 = scmp.ne.s32.totalorder %s945_s1, %s704_s11  ;;  %p708_p9 = scmp.lt.u32.totalorder %s704_s11, %s945_s1 }
  0x17   :  { %p710_p10 = pnand %p708_p9, %p705_p8 }
  0x19   :  { %713 = shalt.err (!%p710_p10)
}
  0x1a   :  { %s714_s16 = scalar_lea.vmem %s816_s21, 1024  ;;  %p719_p12 = scmp.lt.s32.totalorder %s816_s21, %s816_s21 }
  0x1b   :  { %p715_p11 = scmp.ne.s32.totalorder %s816_s21, %s714_s16  ;;  %p720_p13 = scmp.lt.s32.totalorder %s714_s16, %s714_s16 }
  0x1d   :  { %p721_p0 = por %p720_p13, %p719_p12 }
  0x1f   :  { %p722_p1 = pnand %p721_p0, %p715_p11 }
  0x21   :  { %725 = shalt.err (!%p722_p1)
}
  0x22   :  { %26 = dma.hbm_to_vmem [thread:$0]  %s945_s1, 1024, %s816_s21, [#allocation3], %s778_s30, %s778_s30, %s779_s6  }
  0x23   :  { %s780_s18 = smov [#allocation7]   ;;  %s726_s23 = scalar_lea.hbm %s947_s3, 1024 }
  0x24   :  { %s44_s19 = sshll.u32 %s780_s18, 4  ;;  %p727_p2 = scmp.ne.s32.totalorder %s947_s3, %s726_s23  ;;  %s45_s19 = int_to_ptr.vmem [resolvable:$true] %s44_s19 }
  0x25   :  { %p730_p3 = scmp.lt.u32.totalorder %s726_s23, %s947_s3 }
  0x27   :  { %p732_p4 = pnand %p730_p3, %p727_p2 }
  0x29   :  { %735 = shalt.err (!%p732_p4)
}
  0x2a   :  { %s736_s28 = scalar_lea.vmem %s45_s19, 1024  ;;  %p741_p6 = scmp.lt.s32.totalorder %s45_s19, %s45_s19 }
  0x2b   :  { %p737_p5 = scmp.ne.s32.totalorder %s45_s19, %s736_s28  ;;  %p742_p7 = scmp.lt.s32.totalorder %s736_s28, %s736_s28 }
  0x2d   :  { %p743_p8 = por %p742_p7, %p741_p6 }
  0x2f   :  { %p744_p9 = pnand %p743_p8, %p737_p5 }
  0x31   :  { %747 = shalt.err (!%p744_p9)
}
  0x32   :  { %50 = dma.hbm_to_vmem [thread:$0]  %s947_s3, 1024, %s45_s19, [#allocation6], %s778_s30, %s778_s30, %s779_s6  }
  0x33   :  { %770 = dma.done.wait [#allocation3], 1024  }
  0x34   :  { %771 = vsyncadd [#allocation3], 4294966272 }
  0x35   :  { %772 = dma.done.wait [#allocation6], 2048  }
  0x36   :  { %773 = vsyncadd [#allocation6], 4294965248  ;;  %v781_v0 = vmov 0.0   ;;  %vm782_vm0 = vmmov 0   ;;  %v646_v1 = vld [vmem:[#allocation2] sm:$0xff]   ;;  %v647_v2 = vld [vmem:[#allocation2 + $0x8] sm:$0xff]   ;;  %v213_v58 = vlaneseq }
  0x37   :  { %576 = vmatprep.subr.bf16.mxu0 %v781_v0  ;;  %592 = vmatprep.mubr.msk.bf16.mxu0 %vm782_vm0, %v781_v0  ;;  %v648_v3 = vld [vmem:[#allocation2 + $0x10] sm:$0xff]   ;;  %v649_v4 = vld [vmem:[#allocation2 + $0x18] sm:$0xff]   ;;  %v650_v5 = vld [vmem:[#allocation2 + $0x20] sm:$0xff]   ;;  %s783_s19 = smov [#allocation8]  }
  0x38   :  { %596 = vmatprep.subr.bf16.mxu1 %v781_v0  ;;  %612 = vmatprep.mubr.msk.bf16.mxu1 %vm782_vm0, %v781_v0  ;;  %v651_v6 = vld [vmem:[#allocation2 + $0x28] sm:$0xff]   ;;  %v652_v7 = vld [vmem:[#allocation2 + $0x30] sm:$0xff]   ;;  %v653_v8 = vld [vmem:[#allocation2 + $0x38] sm:$0xff]   ;;  %v900_v59 = vshrl.u32 %v213_v58, 7  ;;  %s503_s20 = sshll.u32 %s783_s19, 4  ;;  %s504_s20 = int_to_ptr.vmem [resolvable:$true] %s503_s20 }
  0x39   :  { %577 = vmatpush3.bf16.msra.mxu0 %v646_v1  ;;  %v63_v9 = vld [vmem:[%s944_s0] sm:$0xff]  ;;  %v64_v10 = vld [vmem:[%s944_s0 + $0x8] sm:$0xff]  ;;  %v656_v14 = vld [vmem:[#allocation5 + $0x10] sm:$0xff]   ;;  %s748_s22 = scalar_lea.vmem %s504_s20, 256  ;;  %p753_p11 = scmp.lt.s32.totalorder %s504_s20, %s504_s20 }
  0x3a   :  { %578 = vmatprep.subr.bf16.mxu0 %v781_v0  ;;  %v68_v11 = vpack.c.bf16 %v64_v10, %v63_v9  ;;  %v654_v12 = vld [vmem:[#allocation5] sm:$0xff]   ;;  %v655_v13 = vld [vmem:[#allocation5 + $0x8] sm:$0xff]   ;;  %v657_v15 = vld [vmem:[#allocation5 + $0x18] sm:$0xff]   ;;  %v215_v61 = vsub.s32 0, %v900_v59  ;;  %p749_p10 = scmp.ne.s32.totalorder %s504_s20, %s748_s22  ;;  %p754_p12 = scmp.lt.s32.totalorder %s748_s22, %s748_s22 }
  0x3b   :  { %597 = vmatpush3.bf16.msra.mxu1 %v654_v12  ;;  %v658_v16 = vld [vmem:[#allocation5 + $0x20] sm:$0xff]   ;;  %v659_v17 = vld [vmem:[#allocation5 + $0x28] sm:$0xff]   ;;  %v660_v18 = vld [vmem:[#allocation5 + $0x30] sm:$0xff]  }
  0x3c   :  { %598 = vmatprep.subr.bf16.mxu1 %v781_v0  ;;  %v661_v19 = vld [vmem:[#allocation5 + $0x38] sm:$0xff]   ;;  %v516_v20 = vld [vmem:[%s948_s4] ss:$0 sm:$0xff]  ;;  %v66_v60 = vld [vmem:[%s948_s4 + $0x1] sm:$0x1]  ;;  %p755_p13 = por %p754_p12, %p753_p11 }
  0x3d   :  { %579 = vmatpush3.bf16.msra.mxu0 %v647_v2  ;;  %v527_v2 = vld [vmem:[%s948_s4 + $0x2] ss:$0 sm:$0xff]  ;;  %v663_v9 = vld [vmem:[#allocation7 + $0x8] sm:$0xff]   ;;  %v664_v10 = vld [vmem:[#allocation7 + $0x10] sm:$0xff]  }
  0x3e   :  { %580 = vmatprep.subr.bf16.mxu0 %v781_v0  ;;  %v666_v12 = vld [vmem:[#allocation7 + $0x20] sm:$0xff]   ;;  %p756_p0 = pnand %p755_p13, %p749_p10 }
  0x3f   :  { %599 = vmatpush3.bf16.msra.mxu1 %v655_v13  ;;  %v667_v13 = vld [vmem:[#allocation7 + $0x28] sm:$0xff]  }
  0x40   :  { %600 = vmatprep.subr.bf16.mxu1 %v781_v0 }
  0x41   :  { %581 = vmatpush3.bf16.msra.mxu0 %v648_v3 }
  0x42   :  { %582 = vmatprep.subr.bf16.mxu0 %v781_v0 }
  0x43   :  { %601 = vmatpush3.bf16.msra.mxu1 %v656_v14  ;;  %v668_v14 = vld [vmem:[#allocation7 + $0x30] sm:$0xff]  }
  0x44   :  { %602 = vmatprep.subr.bf16.mxu1 %v781_v0 }
  0x45   :  { %583 = vmatpush3.bf16.msra.mxu0 %v649_v4 }
  0x46   :  { %584 = vmatprep.subr.bf16.mxu0 %v781_v0 }
  0x47   :  { %603 = vmatpush3.bf16.msra.mxu1 %v657_v15  ;;  %v669_v15 = vld [vmem:[#allocation7 + $0x38] sm:$0xff]  }
  0x48   :  { %604 = vmatprep.subr.bf16.mxu1 %v781_v0 }
  0x49   :  { %585 = vmatpush3.bf16.msra.mxu0 %v650_v5 }
  0x4a   :  { %586 = vmatprep.subr.bf16.mxu0 %v781_v0 }
  0x4b   :  { %605 = vmatpush3.bf16.msra.mxu1 %v658_v16  ;;  %v528_v16 = vld [vmem:[%s948_s4 + $0x3] ss:$0 sm:$0xff] }
  0x4c   :  { %606 = vmatprep.subr.bf16.mxu1 %v781_v0 }
  0x4d   :  { %587 = vmatpush3.bf16.msra.mxu0 %v651_v6 }
  0x4e   :  { %588 = vmatprep.subr.bf16.mxu0 %v781_v0 }
  0x4f   :  { %607 = vmatpush3.bf16.msra.mxu1 %v659_v17 }
  0x50   :  { %608 = vmatprep.subr.bf16.mxu1 %v781_v0 }
  0x51   :  { %589 = vmatpush3.bf16.msra.mxu0 %v652_v7 }
  0x52   :  { %590 = vmatprep.subr.bf16.mxu0 %v781_v0 }
  0x53   :  { %609 = vmatpush3.bf16.msra.mxu1 %v660_v18 }
  0x54   :  { %610 = vmatprep.subr.bf16.mxu1 %v781_v0 }
  0x55   :  { %591 = vmatpush3.bf16.msra.mxu0 %v653_v8  ;;  %v662_v8 = vld [vmem:[#allocation7] sm:$0xff]  }
  0x56   :  { %616 = vmatprep.subr.bf16.mxu0 %v781_v0 }
  0x57   :  { %611 = vmatpush3.bf16.msra.mxu1 %v661_v19 }
  0x58   :  { %593 = vmatmul.mubr.bf16.vlgmr.msra.gmra.mrb[0].mxu0 %v68_v11  ;;  %v665_v11 = vld [vmem:[#allocation7 + $0x18] sm:$0xff]  }
  0x59   :  { %632 = vmatprep.mubr.msk.bf16.mxu0 %vm782_vm0, %v781_v0  ;;  %617 = vmatpush3.bf16.msra.mxu0 %v662_v8 }
  0x5a   :  { %618 = vmatprep.subr.bf16.mxu0 %v781_v0 }
  0x5d   :  { %619 = vmatpush3.bf16.msra.mxu0 %v663_v9 }
  0x5e   :  { %620 = vmatprep.subr.bf16.mxu0 %v781_v0 }
  0x61   :  { %621 = vmatpush3.bf16.msra.mxu0 %v664_v10 }
  0x62   :  { %622 = vmatprep.subr.bf16.mxu0 %v781_v0 }
  0x65   :  { %623 = vmatpush3.bf16.msra.mxu0 %v665_v11 }
  0x66   :  { %624 = vmatprep.subr.bf16.mxu0 %v781_v0 }
  0x69   :  { %625 = vmatpush3.bf16.msra.mxu0 %v666_v12 }
  0x6a   :  { %626 = vmatprep.subr.bf16.mxu0 %v781_v0 }
  0x6d   :  { %627 = vmatpush3.bf16.msra.mxu0 %v667_v13 }
  0x6e   :  { %628 = vmatprep.subr.bf16.mxu0 %v781_v0 }
  0x71   :  { %629 = vmatpush3.bf16.msra.mxu0 %v668_v14 }
  0x72   :  { %630 = vmatprep.subr.bf16.mxu0 %v781_v0 }
  0x75   :  { %631 = vmatpush3.bf16.msra.mxu0 %v669_v15 }
 0x12b   :  { %v171_v21 = vpop.f32.mrb[0].mxu0 }
 0x12c   :  { %v172_v22 = vadd.f32 %v516_v20, %v171_v21  ;;  %v594_v23 = vpop.f32.mrb[1].mxu0 }
 0x12d   :  { %v174_v24 = vpop.f32.mrb[2].mxu0 }
 0x12e   :  { %v180_v25 = vmin.f32 %v172_v22, 0.0  ;;  %v175_v26 = vadd.f32 %v516_v20, %v174_v24  ;;  %v595_v27 = vpop.f32.mrb[3].mxu0  ;;  %vm178_vm1 = vcmp.gt.f32.partialorder %v172_v22, 0.0 }
 0x130   :  { %v182_v28 = vmul.f32 1.442695, %v180_v25  ;;  %v181_v29 = vmin.f32 %v175_v26, 0.0  ;;  %vm179_vm2 = vcmp.gt.f32.partialorder %v175_v26, 0.0 }
 0x132   :  { %670 = vpow2.f32 %v182_v28  ;;  %v184_v30 = vmul.f32 1.442695, %v181_v29 }
 0x134   :  { %672 = vpow2.f32 %v184_v30 }
 0x13c   :  { %v671_v31 = vpop.eup %670 }
 0x13d   :  { %v525_v32 = vadd.f32 -1.0, %v671_v31 }
 0x13e   :  { %v673_v33 = vpop.eup %672 }
 0x13f   :  { %v526_v34 = vadd.f32 -1.0, %v673_v33  ;;  %v188_v35 = vsel %vm178_vm1, %v172_v22, %v525_v32 }
 0x141   :  { %v189_v36 = vsel %vm179_vm2, %v175_v26, %v526_v34 }
 0x142   :  { %v190_v37 = vadd.f32 %v189_v36, %v188_v35 }
 0x144   :  { %v191_v38 = vrot.slane %v190_v37, 4 }
 0x146   :  { %v192_v39 = vadd.f32 %v191_v38, %v190_v37 }
 0x148   :  { %v193_v40 = vrot.slane %v192_v39, 2 }
 0x14a   :  { %v194_v41 = vadd.f32 %v193_v40, %v192_v39 }
 0x14c   :  { %v195_v42 = vrot.slane %v194_v41, 1 }
 0x14e   :  { %v196_v43 = vadd.f32 %v195_v42, %v194_v41 }
 0x150   :  { %v197_v44 = vmul.f32 0.0625, %v196_v43 }
 0x152   :  { %v198_v45 = vsub.f32 %v188_v35, %v197_v44  ;;  %v199_v46 = vsub.f32 %v189_v36, %v197_v44 }
 0x154   :  { %v200_v47 = vmul.f32 %v198_v45, %v198_v45  ;;  %v201_v48 = vmul.f32 %v199_v46, %v199_v46 }
 0x156   :  { %v202_v49 = vadd.f32 %v201_v48, %v200_v47 }
 0x158   :  { %v203_v50 = vrot.slane %v202_v49, 4 }
 0x15a   :  { %v204_v51 = vadd.f32 %v203_v50, %v202_v49 }
 0x15c   :  { %v205_v52 = vrot.slane %v204_v51, 2 }
 0x15e   :  { %v206_v53 = vadd.f32 %v205_v52, %v204_v51 }
 0x160   :  { %v207_v54 = vrot.slane %v206_v53, 1 }
 0x162   :  { %v208_v55 = vadd.f32 %v207_v54, %v206_v53  ;;  %v226_v53 = vld [vmem:[%s948_s4 + $0x4] sm:$0x1] }
 0x164   :  { %v209_v56 = vmul.f32 0.0625, %v208_v55 }
 0x166   :  { %v210_v57 = vadd.f32 1e-05, %v209_v56 }
 0x168   :  { %674 = vrsqrt.f32 %v210_v57  ;;  %v539_v57 = vld [vmem:[%s948_s4 + $0x5] ss:$0 sm:$0xff] }
 0x172   :  { %v675_v62 = vpop.eup %674 }
 0x173   :  { %v212_v63 = vmul.f32 %v675_v62, %v66_v60 }
 0x175   :  { %v216_v1 = vrot.slane %v212_v63, %v215_v61 }
 0x177   :  { %v217_v3 = vmul.f32 %v216_v1, %v198_v45  ;;  %v218_v4 = vmul.f32 %v216_v1, %v199_v46 }
 0x179   :  { %v223_v5 = vadd.f32 %v527_v2, %v217_v3  ;;  %v224_v6 = vadd.f32 %v527_v2, %v218_v4  ;;  %v540_v2 = vld [vmem:[%s948_s4 + $0x6] ss:$0 sm:$0xff] }
 0x17b   :  { %v228_v7 = vpack.c.bf16 %v224_v6, %v223_v5 }
 0x17d   :  { %613 = vmatmul.mubr.bf16.vlgmr.msra.gmra.mrb[0].mxu1 %v228_v7 }
 0x250   :  { %v331_v17 = vpop.f32.mrb[0].mxu1 }
 0x251   :  { %v332_v18 = vadd.f32 %v528_v16, %v331_v17  ;;  %v614_v19 = vpop.f32.mrb[1].mxu1 }
 0x252   :  { %v334_v20 = vpop.f32.mrb[2].mxu1 }
 0x253   :  { %v340_v21 = vmin.f32 %v332_v18, 0.0  ;;  %v335_v22 = vadd.f32 %v528_v16, %v334_v20  ;;  %v615_v23 = vpop.f32.mrb[3].mxu1  ;;  %vm338_vm3 = vcmp.gt.f32.partialorder %v332_v18, 0.0 }
 0x255   :  { %v342_v24 = vmul.f32 1.442695, %v340_v21  ;;  %v341_v25 = vmin.f32 %v335_v22, 0.0  ;;  %vm339_vm4 = vcmp.gt.f32.partialorder %v335_v22, 0.0 }
 0x257   :  { %676 = vpow2.f32 %v342_v24  ;;  %v344_v26 = vmul.f32 1.442695, %v341_v25 }
 0x259   :  { %678 = vpow2.f32 %v344_v26 }
 0x261   :  { %v677_v27 = vpop.eup %676 }
 0x262   :  { %v537_v0 = vadd.f32 -1.0, %v677_v27 }
 0x263   :  { %v679_v28 = vpop.eup %678 }
 0x264   :  { %v538_v29 = vadd.f32 -1.0, %v679_v28  ;;  %v348_v30 = vsel %vm338_vm3, %v332_v18, %v537_v0 }
 0x266   :  { %v349_v31 = vsel %vm339_vm4, %v335_v22, %v538_v29 }
 0x267   :  { %v350_v32 = vadd.f32 %v349_v31, %v348_v30 }
 0x269   :  { %v351_v33 = vrot.slane %v350_v32, 4 }
 0x26b   :  { %v352_v34 = vadd.f32 %v351_v33, %v350_v32 }
 0x26d   :  { %v353_v35 = vrot.slane %v352_v34, 2 }
 0x26f   :  { %v354_v36 = vadd.f32 %v353_v35, %v352_v34 }
 0x271   :  { %v355_v37 = vrot.slane %v354_v36, 1 }
 0x273   :  { %v356_v38 = vadd.f32 %v355_v37, %v354_v36 }
 0x275   :  { %v357_v39 = vmul.f32 0.0625, %v356_v38 }
 0x277   :  { %v358_v40 = vsub.f32 %v348_v30, %v357_v39  ;;  %v359_v41 = vsub.f32 %v349_v31, %v357_v39 }
 0x279   :  { %v360_v42 = vmul.f32 %v358_v40, %v358_v40  ;;  %v361_v43 = vmul.f32 %v359_v41, %v359_v41 }
 0x27b   :  { %v362_v44 = vadd.f32 %v361_v43, %v360_v42 }
 0x27d   :  { %v363_v45 = vrot.slane %v362_v44, 4 }
 0x27f   :  { %v364_v46 = vadd.f32 %v363_v45, %v362_v44 }
 0x281   :  { %v365_v47 = vrot.slane %v364_v46, 2 }
 0x283   :  { %v366_v48 = vadd.f32 %v365_v47, %v364_v46 }
 0x285   :  { %v367_v49 = vrot.slane %v366_v48, 1 }
 0x287   :  { %v368_v50 = vadd.f32 %v367_v49, %v366_v48 }
 0x289   :  { %v369_v51 = vmul.f32 0.0625, %v368_v50 }
 0x28b   :  { %v370_v52 = vadd.f32 1e-05, %v369_v51 }
 0x28d   :  { %680 = vrsqrt.f32 %v370_v52 }
 0x297   :  { %v681_v54 = vpop.eup %680 }
 0x298   :  { %v372_v55 = vmul.f32 %v681_v54, %v226_v53 }
 0x29a   :  { %v376_v56 = vrot.slane %v372_v55, %v215_v61 }
 0x29c   :  { %v378_v58 = vmul.f32 %v376_v56, %v359_v41  ;;  %v377_v60 = vmul.f32 %v376_v56, %v358_v40 }
 0x29e   :  { %v383_v62 = vadd.f32 %v539_v57, %v377_v60  ;;  %v384_v63 = vadd.f32 %v539_v57, %v378_v58 }
 0x2a0   :  { %v386_v1 = vpack.c.bf16 %v384_v63, %v383_v62 }
 0x2a2   :  { %633 = vmatmul.mubr.bf16.vlgmr.msra.gmra.mrb[4].mxu0 %v386_v1 }
 0x375   :  { %v489_v3 = vpop.f32.mrb[4].mxu0 }
 0x376   :  { %v490_v4 = vadd.f32 %v540_v2, %v489_v3  ;;  %v634_v59 = vpop.f32.mrb[5].mxu0 }
 0x377   :  { %v492_v61 = vpop.f32.mrb[6].mxu0 }
 0x378   :  { %496 = vst [vmem:[#allocation8] sm:$0xff] %v490_v4  ;;  %v493_v5 = vadd.f32 %v540_v2, %v492_v61  ;;  %v635_v6 = vpop.f32.mrb[7].mxu0 }
 0x37a   :  { %497 = vst [vmem:[#allocation8 + $0x8] sm:$0xff] %v493_v5 }
 0x37b   :  { %759 = shalt.err (!%p756_p0)
}
 0x37c   :  { %s760_s24 = scalar_lea.hbm %s949_s5, 256 }
 0x37d   :  { %p761_p1 = scmp.ne.s32.totalorder %s949_s5, %s760_s24  ;;  %p764_p2 = scmp.lt.u32.totalorder %s760_s24, %s949_s5 }
 0x37f   :  { %p766_p3 = pnand %p764_p2, %p761_p1 }
 0x381   :  { %769 = shalt.err (!%p766_p3)
}
 0x382   :  { %s784_s1 = smov 128   ;;  %s785_s21 = smov 8  }
 0x383   :  { %509 = dma.vmem_to_hbm [thread:$0]  %s504_s20, 256, %s949_s5, [#allocation4], %s784_s1, %s784_s1, %s785_s21  }
 0x384   :  { %774 = dma.done.wait [#allocation4], 256  }
 0x385   :  { %775 = vsyncadd [#allocation4], 4294967040 }
 0x386   :  { %513 = vsyncpa [#allocation3], 1 }
 0x387   :  { %514 = vsyncpa [#allocation6], 1 }
 0x388   :  { %515 = vsyncpa [#allocation4], 1 }

</bundles_post_ra>
